<compile_context>
chip_gen: v7x
topology: tpu7x:2x2x1
jax: 0.10.0
libtpu: 0.0.40
codegen_flags: <defaults>
</compile_context>

<pallas_src>
import numpy as np
import jax
import jax.numpy as jnp
from jax.experimental import pallas as pl
from jax.experimental.pallas import tpu as pltpu

# Keep every f32 matmul (kernel, interpret path, and reference) at true f32
# so numerics match the PyTorch float32 semantics of nn.Linear.
jax.config.update("jax_default_matmul_precision", "highest")

_HIGHEST = jax.lax.Precision.HIGHEST


def _round_up(v: int, m: int) -> int:
    return (v + m - 1) // m * m


# ----------------------------- in-kernel math helpers -----------------------------
def _erf(x):
    # Abramowitz & Stegun 7.1.26, |err| <= 1.5e-7. Exact divide (no approx recip).
    a1, a2, a3, a4, a5 = (0.254829592, -0.284496736, 1.421413741,
                          -1.453152027, 1.061405429)
    p = 0.3275911
    s = jnp.where(x >= 0.0, 1.0, -1.0)
    z = jnp.abs(x)
    t = 1.0 / (1.0 + p * z)
    poly = ((((a5 * t + a4) * t + a3) * t + a2) * t + a1) * t
    return s * (1.0 - poly * jnp.exp(-z * z))


def _gelu_exact(x):
    # nn.GELU() default: 0.5 * x * (1 + erf(x / sqrt(2)))
    return 0.5 * x * (1.0 + _erf(x * 0.7071067811865476))


# ----------------------------------- kernel ----------------------------------------
def _fcblock_kernel(x_ref, w1_ref, b1_ref, w2_ref, b2_ref, o_ref):
    """Fused linear1 + exact GELU + linear2 on one row tile."""
    h = jnp.dot(x_ref[...], w1_ref[...],
                preferred_element_type=jnp.float32, precision=_HIGHEST)
    h = _gelu_exact(h + b1_ref[...])
    y = jnp.dot(h, w2_ref[...],
                preferred_element_type=jnp.float32, precision=_HIGHEST)
    o_ref[...] = (y + b2_ref[...]).astype(o_ref.dtype)


# ----------------------------------- wrapper ---------------------------------------
def fcblock_forward(x, w1, b1, w2, b2, *, tm=256):
    """x: (..., in_channels). w1: (hidden, in), b1: (hidden,), w2: (out, hidden),
    b2: (out,).  Returns (..., out_channels), matching Linear -> GELU -> Linear."""
    orig_shape = x.shape
    Din = orig_shape[-1]
    Dh, Do = w1.shape[0], w2.shape[0]
    M = int(np.prod(orig_shape[:-1]))

    # Lane-pad feature dims to multiples of 128; clamp tm (multiple of 8) to VMEM.
    Din_p, Dh_p, Do_p = (_round_up(d, 128) for d in (Din, Dh, Do))
    tm = _round_up(max(8, min(tm, _round_up(M, 8))), 8)

    def _footprint(t):  # bytes: 2x-buffered x/out blocks + resident weights/biases
        return 4 * (2 * t * (Din_p + Do_p) + t * Dh_p
                    + Din_p * Dh_p + Dh_p * Do_p + Dh_p + Do_p)

    while tm > 8 and _footprint(tm) > (40 << 20):   # stay well inside v7x's 64 MiB
        tm = _round_up(max(tm // 2, 8), 8)
    M_p = _round_up(M, tm)

    # Zero-padded GEMM operands (padding contributes exactly zero to real outputs).
    x2 = jnp.zeros((M_p, Din_p), jnp.float32).at[:M, :Din].set(
        x.reshape(M, Din).astype(jnp.float32))
    w1t = jnp.zeros((Din_p, Dh_p), jnp.float32).at[:Din, :Dh].set(w1.T.astype(jnp.float32))
    b1p = jnp.zeros((1, Dh_p), jnp.float32).at[0, :Dh].set(b1.astype(jnp.float32))
    w2t = jnp.zeros((Dh_p, Do_p), jnp.float32).at[:Dh, :Do].set(w2.T.astype(jnp.float32))
    b2p = jnp.zeros((1, Do_p), jnp.float32).at[0, :Do].set(b2.astype(jnp.float32))

    grid = (M_p // tm,)
    out_p = pl.pallas_call(
        _fcblock_kernel,
        out_shape=jax.ShapeDtypeStruct((M_p, Do_p), jnp.float32),
        grid_spec=pltpu.PrefetchScalarGridSpec(
            num_scalar_prefetch=0,
            grid=grid,
            in_specs=[
                pl.BlockSpec((tm, Din_p), lambda i: (i, 0)),      # streamed row tiles
                pl.BlockSpec((Din_p, Dh_p), lambda i: (0, 0)),    # resident W1^T
                pl.BlockSpec((1, Dh_p), lambda i: (0, 0)),        # resident b1
                pl.BlockSpec((Dh_p, Do_p), lambda i: (0, 0)),     # resident W2^T
                pl.BlockSpec((1, Do_p), lambda i: (0, 0)),        # resident b2
            ],
            out_specs=pl.BlockSpec((tm, Do_p), lambda i: (i, 0)), # lane-dense output
        ),
        compiler_params=pltpu.CompilerParams(
            dimension_semantics=("parallel",),                    # megacore-splittable
            vmem_limit_bytes=int(min(max(2 * _footprint(tm), 16 << 20), 48 << 20)),
        ),
    )(x2, w1t, b1p, w2t, b2p)

    out = out_p[:M, :Do]
    return out.reshape(orig_shape[:-1] + (Do,))


# ------------------------------ pure-JAX reference ---------------------------------
def fcblock_reference(x, w1, b1, w2, b2):
    h = jnp.dot(x, w1.T, precision=_HIGHEST) + b1
    h = jax.nn.gelu(h, approximate=False)                # nn.GELU() default = exact erf
    return jnp.dot(h, w2.T, precision=_HIGHEST) + b2


if __name__ == "__main__":
    key = jax.random.PRNGKey(0)
    batch, seq, in_channels, out_channels = 2, 8, 32, 64
    k1, k2, k3, k4, k5 = jax.random.split(key, 5)

    x = jax.random.normal(k1, (batch, seq, in_channels), jnp.float32)
    # nn.Linear parameters: weight (out_features, in_features), bias (out_features,)
    w1 = jax.random.normal(k2, (out_channels, in_channels), jnp.float32) / np.sqrt(in_channels)
    b1 = 0.1 * jax.random.normal(k3, (out_channels,), jnp.float32)
    w2 = jax.random.normal(k4, (out_channels, out_channels), jnp.float32) / np.sqrt(out_channels)
    b2 = 0.1 * jax.random.normal(k5, (out_channels,), jnp.float32)

    out = jax.block_until_ready(fcblock_forward(x, w1, b1, w2, b2))
    assert out.shape == (batch, seq, out_channels) and out.dtype == jnp.float32

    ref = fcblock_reference(x, w1, b1, w2, b2)
    np.testing.assert_allclose(np.asarray(out), np.asarray(ref), rtol=2e-3, atol=2e-3)

    print("KERNEL_OK")
</pallas_src>

<mosaic_0001>
module attributes {stable_mosaic.version = 11 : i64} {
  func.func @_fcblock_kernel(%arg0: i32, %arg1: memref<16x128xf32, #tpu.memory_space<vmem>>, %arg2: memref<128x128xf32, #tpu.memory_space<vmem>>, %arg3: memref<1x128xf32, #tpu.memory_space<vmem>>, %arg4: memref<128x128xf32, #tpu.memory_space<vmem>>, %arg5: memref<1x128xf32, #tpu.memory_space<vmem>>, %arg6: memref<16x128xf32, #tpu.memory_space<vmem>>) attributes {dimension_semantics = [#tpu.dimension_semantics<parallel>], iteration_bounds = array<i64: 1>, scalar_prefetch = 0 : i64, scratch_operands = 0 : i64, tpu.core_type = #tpu.core_type<tc>, window_params = [{transform_indices = @transform_0, window_bounds = array<i64: 16, 128>}, {pipeline_mode = #tpu.pipeline_mode<synchronous>, transform_indices = @transform_1, window_bounds = array<i64: 128, 128>}, {pipeline_mode = #tpu.pipeline_mode<synchronous>, transform_indices = @transform_2, window_bounds = array<i64: 1, 128>}, {pipeline_mode = #tpu.pipeline_mode<synchronous>, transform_indices = @transform_3, window_bounds = array<i64: 128, 128>}, {pipeline_mode = #tpu.pipeline_mode<synchronous>, transform_indices = @transform_4, window_bounds = array<i64: 1, 128>}, {transform_indices = @transform_5, window_bounds = array<i64: 16, 128>}]} {
    %c0 = arith.constant 0 : index
    %c0_0 = arith.constant 0 : index
    %0 = vector.load %arg1[%c0, %c0_0] : memref<16x128xf32, #tpu.memory_space<vmem>>, vector<16x128xf32>
    %c0_1 = arith.constant 0 : index
    %c0_2 = arith.constant 0 : index
    %1 = vector.load %arg2[%c0_1, %c0_2] : memref<128x128xf32, #tpu.memory_space<vmem>>, vector<128x128xf32>
    %cst = arith.constant dense<0.000000e+00> : vector<16x128xf32>
    %2 = tpu.matmul %0, %1, %cst {dimension_numbers = #tpu.dot_dimension_numbers<[1], [0], [0], [1], [0, 0, 1, 1], [], []>, precision = #tpu.contract_precision<fp32>} : vector<16x128xf32>, vector<128x128xf32>, vector<16x128xf32> -> vector<16x128xf32>
    %c0_3 = arith.constant 0 : index
    %c0_4 = arith.constant 0 : index
    %3 = vector.load %arg3[%c0_3, %c0_4] : memref<1x128xf32, #tpu.memory_space<vmem>>, vector<1x128xf32>
    %4 = vector.broadcast %3 : vector<1x128xf32> to vector<16x128xf32>
    %5 = arith.addf %2, %4 : vector<16x128xf32>
    %cst_5 = arith.constant 5.000000e-01 : f32
    %6 = vector.broadcast %cst_5 : f32 to vector<16x128xf32>
    %7 = arith.mulf %6, %5 : vector<16x128xf32>
    %cst_6 = arith.constant 0.707106769 : f32
    %8 = vector.broadcast %cst_6 : f32 to vector<16x128xf32>
    %9 = arith.mulf %5, %8 : vector<16x128xf32>
    %cst_7 = arith.constant 0.000000e+00 : f32
    %10 = vector.broadcast %cst_7 : f32 to vector<16x128xf32>
    %11 = arith.cmpf oge, %9, %10 : vector<16x128xf32>
    %cst_8 = arith.constant 1.000000e+00 : f32
    %cst_9 = arith.constant -1.000000e+00 : f32
    %12 = vector.broadcast %cst_8 : f32 to vector<16x128xf32>
    %13 = vector.broadcast %cst_9 : f32 to vector<16x128xf32>
    %14 = arith.select %11, %12, %13 : vector<16x128xi1>, vector<16x128xf32>
    %15 = math.absf %9 : vector<16x128xf32>
    %cst_10 = arith.constant 0.327591091 : f32
    %16 = vector.broadcast %cst_10 : f32 to vector<16x128xf32>
    %17 = arith.mulf %16, %15 : vector<16x128xf32>
    %cst_11 = arith.constant 1.000000e+00 : f32
    %18 = vector.broadcast %cst_11 : f32 to vector<16x128xf32>
    %19 = arith.addf %18, %17 : vector<16x128xf32>
    %cst_12 = arith.constant 1.000000e+00 : f32
    %20 = vector.broadcast %cst_12 : f32 to vector<16x128xf32>
    %21 = arith.divf %20, %19 : vector<16x128xf32>
    %cst_13 = arith.constant 1.06140542 : f32
    %22 = vector.broadcast %cst_13 : f32 to vector<16x128xf32>
    %23 = arith.mulf %22, %21 : vector<16x128xf32>
    %cst_14 = arith.constant -1.45315206 : f32
    %24 = vector.broadcast %cst_14 : f32 to vector<16x128xf32>
    %25 = arith.addf %23, %24 : vector<16x128xf32>
    %26 = arith.mulf %25, %21 : vector<16x128xf32>
    %cst_15 = arith.constant 1.42141378 : f32
    %27 = vector.broadcast %cst_15 : f32 to vector<16x128xf32>
    %28 = arith.addf %26, %27 : vector<16x128xf32>
    %29 = arith.mulf %28, %21 : vector<16x128xf32>
    %cst_16 = arith.constant -0.284496725 : f32
    %30 = vector.broadcast %cst_16 : f32 to vector<16x128xf32>
    %31 = arith.addf %29, %30 : vector<16x128xf32>
    %32 = arith.mulf %31, %21 : vector<16x128xf32>
    %cst_17 = arith.constant 0.254829586 : f32
    %33 = vector.broadcast %cst_17 : f32 to vector<16x128xf32>
    %34 = arith.addf %32, %33 : vector<16x128xf32>
    %35 = arith.mulf %34, %21 : vector<16x128xf32>
    %cst_18 = arith.constant 0.000000e+00 : f32
    %36 = vector.broadcast %cst_18 : f32 to vector<16x128xf32>
    %37 = arith.subf %36, %15 : vector<16x128xf32>
    %38 = arith.mulf %37, %15 : vector<16x128xf32>
    %39 = math.exp %38 : vector<16x128xf32>
    %40 = arith.mulf %35, %39 : vector<16x128xf32>
    %cst_19 = arith.constant 1.000000e+00 : f32
    %41 = vector.broadcast %cst_19 : f32 to vector<16x128xf32>
    %42 = arith.subf %41, %40 : vector<16x128xf32>
    %43 = arith.mulf %14, %42 : vector<16x128xf32>
    %cst_20 = arith.constant 1.000000e+00 : f32
    %44 = vector.broadcast %cst_20 : f32 to vector<16x128xf32>
    %45 = arith.addf %44, %43 : vector<16x128xf32>
    %46 = arith.mulf %7, %45 : vector<16x128xf32>
    %c0_21 = arith.constant 0 : index
    %c0_22 = arith.constant 0 : index
    %47 = vector.load %arg4[%c0_21, %c0_22] : memref<128x128xf32, #tpu.memory_space<vmem>>, vector<128x128xf32>
    %cst_23 = arith.constant dense<0.000000e+00> : vector<16x128xf32>
    %48 = tpu.matmul %46, %47, %cst_23 {dimension_numbers = #tpu.dot_dimension_numbers<[1], [0], [0], [1], [0, 0, 1, 1], [], []>, precision = #tpu.contract_precision<fp32>} : vector<16x128xf32>, vector<128x128xf32>, vector<16x128xf32> -> vector<16x128xf32>
    %c0_24 = arith.constant 0 : index
    %c0_25 = arith.constant 0 : index
    %49 = vector.load %arg5[%c0_24, %c0_25] : memref<1x128xf32, #tpu.memory_space<vmem>>, vector<1x128xf32>
    %50 = vector.broadcast %49 : vector<1x128xf32> to vector<16x128xf32>
    %51 = arith.addf %48, %50 : vector<16x128xf32>
    %c0_26 = arith.constant 0 : index
    %c0_27 = arith.constant 0 : index
    %52 = vector.load %arg6[%c0_26, %c0_27] : memref<16x128xf32, #tpu.memory_space<vmem>>, vector<16x128xf32>
    tpu.vector_store %arg6[%c0_26, %c0_27], %51 {strides = array<i32>} : memref<16x128xf32, #tpu.memory_space<vmem>>, vector<16x128xf32>,
    return
  }
  func.func @transform_0(%arg0: i32) -> (i32, i32) {
    %c0_i32 = arith.constant 0 : i32
    %c0_i32_0 = arith.constant 0 : i32
    return %arg0, %c0_i32 : i32, i32
  }
  func.func @transform_1(%arg0: i32) -> (i32, i32) {
    %c0_i32 = arith.constant 0 : i32
    %c0_i32_0 = arith.constant 0 : i32
    %c0_i32_1 = arith.constant 0 : i32
    return %c0_i32, %c0_i32_0 : i32, i32
  }
  func.func @transform_2(%arg0: i32) -> (i32, i32) {
    %c0_i32 = arith.constant 0 : i32
    %c0_i32_0 = arith.constant 0 : i32
    %c0_i32_1 = arith.constant 0 : i32
    return %c0_i32, %c0_i32_0 : i32, i32
  }
  func.func @transform_3(%arg0: i32) -> (i32, i32) {
    %c0_i32 = arith.constant 0 : i32
    %c0_i32_0 = arith.constant 0 : i32
    %c0_i32_1 = arith.constant 0 : i32
    return %c0_i32, %c0_i32_0 : i32, i32
  }
  func.func @transform_4(%arg0: i32) -> (i32, i32) {
    %c0_i32 = arith.constant 0 : i32
    %c0_i32_0 = arith.constant 0 : i32
    %c0_i32_1 = arith.constant 0 : i32
    return %c0_i32, %c0_i32_0 : i32, i32
  }
  func.func @transform_5(%arg0: i32) -> (i32, i32) {
    %c0_i32 = arith.constant 0 : i32
    %c0_i32_0 = arith.constant 0 : i32
    return %arg0, %c0_i32 : i32, i32
  }
}

</mosaic_0001>

<bundles_post_ra>
// kernel: tpu_custom_call.1
= control target key start
LH: loop header
LB: loop body
LE: loop exit
PB: predicated region body
PF: predicated region fallthrough
CT: control target
= control target key end

     0   :  { %10 = vsyncpa [#allocation3], 0  ;;  %s3372_s0 = inlined_call_operand.hbm [shape: f32[16,128], index: 0, kind: input, shape index: {}]   ;;  %s3373_s1 = inlined_call_operand.hbm [shape: f32[128,128], index: 1, kind: input, shape index: {}]   ;;  %s3374_s2 = inlined_call_operand.vmem [shape: f32[1,128], index: 2, kind: input, shape index: {}]   ;;  %s3375_s3 = inlined_call_operand.hbm [shape: f32[128,128], index: 3, kind: input, shape index: {}]   ;;  %s3376_s4 = inlined_call_operand.vmem [shape: f32[1,128], index: 4, kind: input, shape index: {}]   ;;  %s3377_s5 = inlined_call_operand.hbm [shape: f32[16,128], index: 5, kind: output, shape index: {}]  }
   0x1   :  { %11 = vsyncpa [#allocation6], 0 }
   0x2   :  { %12 = vsyncpa [#allocation4], 0  ;;  %s2707_s18 = smov [#allocation5]   ;;  %s2708_s20 = smov [#allocation2]  }
   0x3   :  { %s30_s19 = sshll.u32 %s2707_s18, 4  ;;  %s18_s21 = sshll.u32 %s2708_s20, 4  ;;  %s31_s19 = int_to_ptr.vmem [resolvable:$true] %s30_s19  ;;  %s2744_s21 = int_to_ptr.vmem [resolvable:$true] %s18_s21 }
   0x4   :  { %s2613_s24 = scalar_lea.hbm %s3373_s1, 2048 }
   0x5   :  { %p2614_p0 = scmp.ne.s32.totalorder %s3373_s1, %s2613_s24  ;;  %p2617_p1 = scmp.lt.u32.totalorder %s2613_s24, %s3373_s1 }
   0x7   :  { %p2619_p2 = pnand %p2617_p1, %p2614_p0 }
   0x9   :  { %2622 = shalt.err (!%p2619_p2)
}
   0xa   :  { %s2623_s29 = scalar_lea.vmem %s31_s19, 2048  ;;  %p2628_p4 = scmp.lt.s32.totalorder %s31_s19, %s31_s19 }
   0xb   :  { %p2624_p3 = scmp.ne.s32.totalorder %s31_s19, %s2623_s29  ;;  %p2629_p5 = scmp.lt.s32.totalorder %s2623_s29, %s2623_s29 }
   0xd   :  { %p2630_p6 = por %p2629_p5, %p2628_p4 }
   0xf   :  { %p2631_p7 = pnand %p2630_p6, %p2624_p3 }
  0x11   :  { %2634 = shalt.err (!%p2631_p7)
}
  0x12   :  { %s2709_s30 = smov 128   ;;  %s2710_s6 = smov 8  }
  0x13   :  { %36 = dma.hbm_to_vmem [thread:$0]  %s3373_s1, 2048, %s31_s19, [#allocation6], %s2709_s30, %s2709_s30, %s2710_s6  }
  0x14   :  { %s2635_s11 = scalar_lea.hbm %s3372_s0, 256 }
  0x15   :  { %p2636_p8 = scmp.ne.s32.totalorder %s3372_s0, %s2635_s11  ;;  %p2639_p9 = scmp.lt.u32.totalorder %s2635_s11, %s3372_s0 }
  0x17   :  { %p2641_p10 = pnand %p2639_p9, %p2636_p8 }
  0x19   :  { %2644 = shalt.err (!%p2641_p10)
}
  0x1a   :  { %s2645_s16 = scalar_lea.vmem %s2744_s21, 256  ;;  %p2650_p12 = scmp.lt.s32.totalorder %s2744_s21, %s2744_s21 }
  0x1b   :  { %p2646_p11 = scmp.ne.s32.totalorder %s2744_s21, %s2645_s16  ;;  %p2651_p13 = scmp.lt.s32.totalorder %s2645_s16, %s2645_s16 }
  0x1d   :  { %p2652_p0 = por %p2651_p13, %p2650_p12 }
  0x1f   :  { %p2653_p1 = pnand %p2652_p0, %p2646_p11 }
  0x21   :  { %2656 = shalt.err (!%p2653_p1)
}
  0x22   :  { %24 = dma.hbm_to_vmem [thread:$0]  %s3372_s0, 256, %s2744_s21, [#allocation3], %s2709_s30, %s2709_s30, %s2710_s6  }
  0x23   :  { %s2711_s18 = smov [#allocation7]   ;;  %s2657_s23 = scalar_lea.hbm %s3375_s3, 2048 }
  0x24   :  { %s44_s19 = sshll.u32 %s2711_s18, 4  ;;  %p2658_p2 = scmp.ne.s32.totalorder %s3375_s3, %s2657_s23  ;;  %s45_s19 = int_to_ptr.vmem [resolvable:$true] %s44_s19 }
  0x25   :  { %p2661_p3 = scmp.lt.u32.totalorder %s2657_s23, %s3375_s3 }
  0x27   :  { %p2663_p4 = pnand %p2661_p3, %p2658_p2 }
  0x29   :  { %2666 = shalt.err (!%p2663_p4)
}
  0x2a   :  { %s2667_s28 = scalar_lea.vmem %s45_s19, 2048  ;;  %p2672_p6 = scmp.lt.s32.totalorder %s45_s19, %s45_s19 }
  0x2b   :  { %p2668_p5 = scmp.ne.s32.totalorder %s45_s19, %s2667_s28  ;;  %p2673_p7 = scmp.lt.s32.totalorder %s2667_s28, %s2667_s28 }
  0x2d   :  { %p2674_p8 = por %p2673_p7, %p2672_p6 }
  0x2f   :  { %p2675_p9 = pnand %p2674_p8, %p2668_p5 }
  0x31   :  { %2678 = shalt.err (!%p2675_p9)
}
  0x32   :  { %50 = dma.hbm_to_vmem [thread:$0]  %s3375_s3, 2048, %s45_s19, [#allocation6], %s2709_s30, %s2709_s30, %s2710_s6  }
  0x33   :  { %2701 = dma.done.wait [#allocation3], 256  }
  0x34   :  { %2702 = vsyncadd [#allocation3], 4294967040 }
  0x35   :  { %2703 = dma.done.wait [#allocation6], 4096  }
  0x36   :  { %2704 = vsyncadd [#allocation6], 4294963200  ;;  %v64_v0 = vld [vmem:[#allocation5] sm:$0xff]  ;;  %v65_v1 = vld [vmem:[#allocation5 + $0x8] sm:$0xff]  ;;  %s2713_s8 = smov [#allocation8]  }
  0x37   :  { %v66_v2 = vld [vmem:[#allocation5 + $0x10] sm:$0xff]  ;;  %v88_v3 = vand.u32 4294901760, %v64_v0  ;;  %v91_v4 = vand.u32 4294901760, %v65_v1  ;;  %v67_v5 = vld [vmem:[#allocation5 + $0x18] sm:$0xff]  ;;  %v68_v7 = vld [vmem:[#allocation5 + $0x20] sm:$0xff]  ;;  %s1539_s9 = sshll.u32 %s2713_s8, 4  ;;  %s1540_s9 = int_to_ptr.vmem [resolvable:$true] %s1539_s9 }
  0x38   :  { %v94_v6 = vand.u32 4294901760, %v66_v2  ;;  %v69_v8 = vld [vmem:[#allocation5 + $0x28] sm:$0xff]  ;;  %v97_v9 = vand.u32 4294901760, %v67_v5  ;;  %v100_v11 = vand.u32 4294901760, %v68_v7  ;;  %v2800_v14 = vld [vmem:[#allocation5 + $0x30] sm:$0xff]  ;;  %v2802_v15 = vld [vmem:[#allocation5 + $0x38] sm:$0xff]  ;;  %p2684_p11 = scmp.lt.s32.totalorder %s1540_s9, %s1540_s9 }
  0x39   :  { %v2796_v10 = vpack.c.bf16 %v91_v4, %v88_v3  ;;  %v103_v12 = vand.u32 4294901760, %v69_v8  ;;  %v62_v16 = vld [vmem:[#allocation2] sm:$0xff]  ;;  %v106_v19 = vand.u32 4294901760, %v2800_v14  ;;  %v109_v20 = vand.u32 4294901760, %v2802_v15  ;;  %v72_v21 = vld [vmem:[#allocation5 + $0x40] sm:$0xff]  ;;  %v73_v22 = vld [vmem:[#allocation5 + $0x48] sm:$0xff] }
  0x3a   :  { %v2798_v13 = vpack.c.bf16 %v97_v9, %v94_v6  ;;  %v2806_v17 = vand.u32 4294901760, %v62_v16  ;;  %v2818_v25 = vsub.f32 %v64_v0, %v88_v3  ;;  %v112_v27 = vand.u32 4294901760, %v72_v21  ;;  %v63_v29 = vld [vmem:[#allocation2 + $0x8] sm:$0xff]  ;;  %v74_v30 = vld [vmem:[#allocation5 + $0x50] sm:$0xff]  ;;  %v76_v33 = vld [vmem:[#allocation5 + $0x60] sm:$0xff]  ;;  %s2679_s10 = scalar_lea.vmem %s1540_s9, 256 }
  0x3b   :  { %2191 = vmatprep.subr.bf16.mxu0 %v2796_v10  ;;  %v2809_v18 = vpack.c.bf16 %v103_v12, %v100_v11  ;;  %v2821_v26 = vpack.c.bf16 %v109_v20, %v106_v19  ;;  %v115_v28 = vand.u32 4294901760, %v73_v22  ;;  %v75_v31 = vld [vmem:[#allocation5 + $0x58] sm:$0xff]  ;;  %v77_v34 = vld [vmem:[#allocation5 + $0x68] sm:$0xff]  ;;  %v78_v35 = vld [vmem:[#allocation5 + $0x70] sm:$0xff]  ;;  %v2826_v36 = vsub.f32 %v65_v1, %v91_v4  ;;  %p2680_p10 = scmp.ne.s32.totalorder %s1540_s9, %s2679_s10  ;;  %p2685_p12 = scmp.lt.s32.totalorder %s2679_s10, %s2679_s10 }
  0x3c   :  { %2193 = vmatpush3.bf16.msra.mxu0 %v2796_v10  ;;  %v2814_v23 = vsub.f32 %v62_v16, %v2806_v17  ;;  %v79_v37 = vld [vmem:[#allocation5 + $0x78] sm:$0xff]  ;;  %v191_v39 = vand.u32 4294901760, %v2818_v25  ;;  %v2830_v40 = vand.u32 4294901760, %v63_v29  ;;  %v2832_v41 = vsub.f32 %v66_v2, %v94_v6 }
  0x3d   :  { %2195 = vmatprep.subr.bf16.mxu0 %v2798_v13  ;;  %v2835_v42 = vpack.c.bf16 %v115_v28, %v112_v27  ;;  %v118_v43 = vand.u32 4294901760, %v74_v30  ;;  %v121_v44 = vand.u32 4294901760, %v75_v31  ;;  %v124_v45 = vand.u32 4294901760, %v76_v33  ;;  %p2686_p13 = por %p2685_p12, %p2684_p11 }
  0x3e   :  { %v170_v24 = vand.u32 4294901760, %v2814_v23  ;;  %v127_v46 = vand.u32 4294901760, %v77_v34  ;;  %v130_v47 = vand.u32 4294901760, %v78_v35  ;;  %v133_v48 = vand.u32 4294901760, %v79_v37 }
  0x3f   :  { %v198_v49 = vand.u32 4294901760, %v2826_v36  ;;  %v2838_v50 = vsub.f32 %v67_v5, %v97_v9  ;;  %v2840_v51 = vsub.f32 %v68_v7, %v100_v11  ;;  %v192_v52 = vsub.f32 %v2818_v25, %v191_v39  ;;  %p2687_p0 = pnand %p2686_p13, %p2680_p10 }
  0x40   :  { %2197 = vmatpush3.bf16.msra.mxu0 %v2798_v13  ;;  %v171_v32 = vsub.f32 %v2814_v23, %v170_v24  ;;  %v2845_v53 = vsub.f32 %v63_v29, %v2830_v40  ;;  %v205_v54 = vand.u32 4294901760, %v2832_v41  ;;  %v2848_v55 = vsub.f32 %v69_v8, %v103_v12 }
  0x41   :  { %2199 = vmatprep.subr.bf16.mxu0 %v2809_v18  ;;  %v2851_v56 = vpack.c.bf16 %v121_v44, %v118_v43  ;;  %v2853_v57 = vpack.c.bf16 %v127_v46, %v124_v45  ;;  %v2855_v58 = vpack.c.bf16 %v133_v48, %v130_v47  ;;  %v199_v59 = vsub.f32 %v2826_v36, %v198_v49 }
  0x42   :  { %v172_v38 = vand.u32 4294901760, %v171_v32  ;;  %v212_v60 = vand.u32 4294901760, %v2838_v50  ;;  %v219_v61 = vand.u32 4294901760, %v2840_v51  ;;  %v193_v62 = vand.u32 4294901760, %v192_v52 }
  0x43   :  { %v180_v63 = vand.u32 4294901760, %v2845_v53  ;;  %v206_v0 = vsub.f32 %v2832_v41, %v205_v54  ;;  %v226_v1 = vand.u32 4294901760, %v2848_v55  ;;  %v2866_v2 = vsub.f32 %v2800_v14, %v106_v19 }
  0x44   :  { %2201 = vmatpush3.bf16.msra.mxu0 %v2809_v18  ;;  %1802 = vmatprep.mubr.f32.mxu0 %v172_v38  ;;  %v2869_v3 = vsub.f32 %v2802_v15, %v109_v20  ;;  %v2871_v4 = vsub.f32 %v72_v21, %v112_v27  ;;  %v2873_v5 = vsub.f32 %v73_v22, %v115_v28  ;;  %v200_v11 = vand.u32 4294901760, %v199_v59 }
  0x45   :  { %2203 = vmatprep.subr.bf16.mxu0 %v2821_v26  ;;  %v2875_v6 = vsub.f32 %v74_v30, %v118_v43  ;;  %v2877_v7 = vsub.f32 %v75_v31, %v121_v44  ;;  %v2879_v8 = vsub.f32 %v76_v33, %v124_v45  ;;  %v2881_v9 = vsub.f32 %v77_v34, %v127_v46 }
  0x46   :  { %v213_v12 = vsub.f32 %v2838_v50, %v212_v60  ;;  %v2884_v14 = vsub.f32 %v78_v35, %v130_v47  ;;  %v2886_v16 = vsub.f32 %v79_v37, %v133_v48  ;;  %v181_v15 = vsub.f32 %v2845_v53, %v180_v63 }
  0x47   :  { %v207_v19 = vand.u32 4294901760, %v206_v0  ;;  %v220_v20 = vsub.f32 %v2840_v51, %v219_v61  ;;  %v227_v21 = vsub.f32 %v2848_v55, %v226_v1  ;;  %v233_v22 = vand.u32 4294901760, %v2866_v2 }
  0x48   :  { %2205 = vmatpush3.bf16.msra.mxu0 %v2821_v26  ;;  %v240_v27 = vand.u32 4294901760, %v2869_v3  ;;  %v247_v28 = vand.u32 4294901760, %v2871_v4  ;;  %v254_v29 = vand.u32 4294901760, %v2873_v5  ;;  %v261_v30 = vand.u32 4294901760, %v2875_v6 }
  0x49   :  { %2207 = vmatprep.subr.bf16.mxu0 %v2835_v42  ;;  %v268_v31 = vand.u32 4294901760, %v2877_v7  ;;  %v275_v32 = vand.u32 4294901760, %v2879_v8  ;;  %v282_v33 = vand.u32 4294901760, %v2881_v9  ;;  %v289_v34 = vand.u32 4294901760, %v2884_v14 }
  0x4a   :  { %v296_v35 = vand.u32 4294901760, %v2886_v16  ;;  %v2905_v37 = vpack.c.bf16 %v198_v49, %v191_v39  ;;  %v2907_v38 = vpack.c.bf16 %v212_v60, %v205_v54  ;;  %v2222_v43 = vpack.c.bf16 %v200_v11, %v193_v62 }
  0x4b   :  { %v2910_v44 = vpack.c.bf16 %v226_v1, %v219_v61  ;;  %v2912_v45 = vpack.c.bf16 %v240_v27, %v233_v22  ;;  %v2914_v46 = vpack.c.bf16 %v254_v29, %v247_v28  ;;  %v214_v47 = vand.u32 4294901760, %v213_v12 }
  0x4c   :  { %2209 = vmatpush3.bf16.msra.mxu0 %v2835_v42  ;;  %v2917_v48 = vpack.c.bf16 %v268_v31, %v261_v30  ;;  %v2919_v52 = vpack.c.bf16 %v282_v33, %v275_v32  ;;  %v2921_v39 = vpack.c.bf16 %v296_v35, %v289_v34  ;;  %v182_v49 = vand.u32 4294901760, %v181_v15 }
  0x4d   :  { %2211 = vmatprep.subr.bf16.mxu0 %v2851_v56  ;;  %v221_v54 = vand.u32 4294901760, %v220_v20  ;;  %v228_v59 = vand.u32 4294901760, %v227_v21  ;;  %v2226_v60 = vpack.c.bf16 %v214_v47, %v207_v19  ;;  %v234_v61 = vsub.f32 %v2866_v2, %v233_v22 }
  0x4e   :  { %v241_v62 = vsub.f32 %v2869_v3, %v240_v27  ;;  %v248_v12 = vsub.f32 %v2871_v4, %v247_v28  ;;  %v255_v15 = vsub.f32 %v2873_v5, %v254_v29  ;;  %v262_v20 = vsub.f32 %v2875_v6, %v261_v30 }
  0x4f   :  { %v2230_v0 = vpack.c.bf16 %v228_v59, %v221_v54  ;;  %v235_v1 = vand.u32 4294901760, %v234_v61  ;;  %v269_v27 = vsub.f32 %v2877_v7, %v268_v31  ;;  %v283_v28 = vsub.f32 %v2881_v9, %v282_v33 }
  0x50   :  { %2213 = vmatpush3.bf16.msra.mxu0 %v2851_v56  ;;  %v242_v11 = vand.u32 4294901760, %v241_v62  ;;  %v249_v21 = vand.u32 4294901760, %v248_v12  ;;  %v256_v22 = vand.u32 4294901760, %v255_v15  ;;  %v297_v61 = vsub.f32 %v2886_v16, %v296_v35 }
  0x51   :  { %2215 = vmatprep.subr.bf16.mxu0 %v2853_v57  ;;  %v270_v54 = vand.u32 4294901760, %v269_v27  ;;  %v284_v30 = vand.u32 4294901760, %v283_v28  ;;  %v2254_v33 = vpack.c.bf16 %v2826_v36, %v2818_v25  ;;  %v2262_v35 = vpack.c.bf16 %v2848_v55, %v2840_v51  ;;  %v829_v55 = vld [vmem:[#allocation7 + $0x20] sm:$0xff] }
  0x52   :  { %v2234_v19 = vpack.c.bf16 %v242_v11, %v235_v1  ;;  %v2238_v47 = vpack.c.bf16 %v256_v22, %v249_v21  ;;  %v2266_v1 = vpack.c.bf16 %v2869_v3, %v2866_v2  ;;  %v2270_v25 = vpack.c.bf16 %v2873_v5, %v2871_v4  ;;  %v832_v2 = vld [vmem:[#allocation7 + $0x38] sm:$0xff] }
  0x53   :  { %v2274_v36 = vpack.c.bf16 %v2877_v7, %v2875_v6  ;;  %v870_v4 = vand.u32 4294901760, %v832_v2  ;;  %v3024_v6 = vld [vmem:[#allocation7 + $0x40] sm:$0xff]  ;;  %v3026_v7 = vld [vmem:[#allocation7 + $0x48] sm:$0xff] }
  0x54   :  { %2217 = vmatpush3.bf16.msra.mxu0 %v2853_v57 }
  0x55   :  { %2219 = vmatprep.subr.bf16.mxu0 %v2855_v58 }
  0x58   :  { %2221 = vmatpush3.bf16.msra.mxu0 %v2855_v58 }
  0x59   :  { %2223 = vmatprep.subr.bf16.mxu0 %v2222_v43 }
  0x5b   :  { %1803 = vmatmul.mubr.f32.vlgmr.msra.gmra.mrb[0].mxu0 %v182_v49  ;;  %v263_v49 = vand.u32 4294901760, %v262_v20  ;;  %v3062_v20 = vld [vmem:[#allocation7 + $0x70] sm:$0xff] }
  0x5c   :  { %2225 = vmatpush3.bf16.msra.mxu0 %v2222_v43  ;;  %1837 = vmatprep.mubr.f32.mxu0 %v2806_v17  ;;  %v276_v43 = vsub.f32 %v2879_v8, %v275_v32  ;;  %v298_v32 = vand.u32 4294901760, %v297_v61  ;;  %v891_v21 = vand.u32 4294901760, %v3062_v20 }
  0x5d   :  { %2227 = vmatprep.subr.bf16.mxu0 %v2226_v60  ;;  %v2242_v59 = vpack.c.bf16 %v270_v54, %v263_v49 }
  0x5e   :  { %v277_v29 = vand.u32 4294901760, %v276_v43 }
  0x60   :  { %2229 = vmatpush3.bf16.msra.mxu0 %v2226_v60  ;;  %v290_v60 = vsub.f32 %v2884_v14, %v289_v34  ;;  %v2246_v31 = vpack.c.bf16 %v284_v30, %v277_v29  ;;  %v2258_v34 = vpack.c.bf16 %v2838_v50, %v2832_v41  ;;  %v2278_v41 = vpack.c.bf16 %v2881_v9, %v2879_v8 }
  0x61   :  { %2231 = vmatprep.subr.bf16.mxu0 %v2230_v0  ;;  %v2282_v50 = vpack.c.bf16 %v2886_v16, %v2884_v14  ;;  %v873_v8 = vand.u32 4294901760, %v3024_v6  ;;  %v876_v9 = vand.u32 4294901760, %v3026_v7  ;;  %v3034_v16 = vld [vmem:[#allocation7 + $0x50] sm:$0xff] }
  0x62   :  { %v291_v62 = vand.u32 4294901760, %v290_v60 }
  0x63   :  { %v3032_v14 = vpack.c.bf16 %v876_v9, %v873_v8 }
  0x64   :  { %2233 = vmatpush3.bf16.msra.mxu0 %v2230_v0  ;;  %v2250_v0 = vpack.c.bf16 %v298_v32, %v291_v62 }
  0x65   :  { %2235 = vmatprep.subr.bf16.mxu0 %v2234_v19 }
  0x68   :  { %2237 = vmatpush3.bf16.msra.mxu0 %v2234_v19  ;;  %v3064_v19 = vld [vmem:[#allocation7 + $0x78] sm:$0xff] }
  0x69   :  { %2239 = vmatprep.subr.bf16.mxu0 %v2238_v47  ;;  %v894_v22 = vand.u32 4294901760, %v3064_v19 }
  0x6c   :  { %2241 = vmatpush3.bf16.msra.mxu0 %v2238_v47  ;;  %v3076_v47 = vpack.c.bf16 %v894_v22, %v891_v21 }
  0x6d   :  { %2243 = vmatprep.subr.bf16.mxu0 %v2242_v59 }
  0x70   :  { %2245 = vmatpush3.bf16.msra.mxu0 %v2242_v59 }
  0x71   :  { %2247 = vmatprep.subr.bf16.mxu0 %v2246_v31 }
  0x74   :  { %2249 = vmatpush3.bf16.msra.mxu0 %v2246_v31 }
  0x75   :  { %2251 = vmatprep.subr.bf16.mxu0 %v2250_v0 }
  0x78   :  { %2253 = vmatpush3.bf16.msra.mxu0 %v2250_v0 }
  0x79   :  { %2255 = vmatprep.subr.bf16.mxu0 %v2254_v33 }
  0x7b   :  { %1838 = vmatmul.mubr.f32.vlgmr.msra.gmra.mrb[0].mxu0 %v2830_v40 }
  0x7c   :  { %2257 = vmatpush3.bf16.msra.mxu0 %v2254_v33  ;;  %1872 = vmatprep.mubr.f32.mxu0 %v2814_v23 }
  0x7d   :  { %2259 = vmatprep.subr.bf16.mxu0 %v2258_v34 }
  0x80   :  { %2261 = vmatpush3.bf16.msra.mxu0 %v2258_v34 }
  0x81   :  { %2263 = vmatprep.subr.bf16.mxu0 %v2262_v35 }
  0x84   :  { %2265 = vmatpush3.bf16.msra.mxu0 %v2262_v35 }
  0x85   :  { %2267 = vmatprep.subr.bf16.mxu0 %v2266_v1 }
  0x88   :  { %2269 = vmatpush3.bf16.msra.mxu0 %v2266_v1 }
  0x89   :  { %2271 = vmatprep.subr.bf16.mxu0 %v2270_v25 }
  0x8c   :  { %2273 = vmatpush3.bf16.msra.mxu0 %v2270_v25 }
  0x8d   :  { %2275 = vmatprep.subr.bf16.mxu0 %v2274_v36 }
  0x90   :  { %2277 = vmatpush3.bf16.msra.mxu0 %v2274_v36 }
  0x91   :  { %2279 = vmatprep.subr.bf16.mxu0 %v2278_v41 }
  0x94   :  { %2281 = vmatpush3.bf16.msra.mxu0 %v2278_v41 }
  0x95   :  { %2283 = vmatprep.subr.bf16.mxu0 %v2282_v50 }
  0x98   :  { %2285 = vmatpush3.bf16.msra.mxu0 %v2282_v50 }
  0x99   :  { %2287 = vmatprep.subr.bf16.mxu0 %v2796_v10 }
  0x9b   :  { %1873 = vmatmul.mubr.f32.vlgmr.msra.gmra.mrb[0].mxu0 %v2845_v53 }
  0x9c   :  { %2289 = vmatpush3.bf16.msra.mxu0 %v2796_v10  ;;  %1907 = vmatprep.mubr.f32.mxu0 %v170_v24  ;;  %v827_v24 = vld [vmem:[#allocation7 + $0x10] sm:$0xff] }
  0x9d   :  { %2291 = vmatprep.subr.bf16.mxu0 %v2798_v13 }
  0xa0   :  { %2293 = vmatpush3.bf16.msra.mxu0 %v2798_v13 }
  0xa1   :  { %2295 = vmatprep.subr.bf16.mxu0 %v2809_v18 }
  0xa4   :  { %2297 = vmatpush3.bf16.msra.mxu0 %v2809_v18 }
  0xa5   :  { %2299 = vmatprep.subr.bf16.mxu0 %v2821_v26 }
  0xa8   :  { %2301 = vmatpush3.bf16.msra.mxu0 %v2821_v26 }
  0xa9   :  { %2303 = vmatprep.subr.bf16.mxu0 %v2835_v42 }
  0xac   :  { %2305 = vmatpush3.bf16.msra.mxu0 %v2835_v42 }
  0xad   :  { %2307 = vmatprep.subr.bf16.mxu0 %v2851_v56 }
  0xb0   :  { %2309 = vmatpush3.bf16.msra.mxu0 %v2851_v56 }
  0xb1   :  { %2311 = vmatprep.subr.bf16.mxu0 %v2853_v57 }
  0xb4   :  { %2313 = vmatpush3.bf16.msra.mxu0 %v2853_v57 }
  0xb5   :  { %2315 = vmatprep.subr.bf16.mxu0 %v2855_v58 }
  0xb8   :  { %2317 = vmatpush3.bf16.msra.mxu0 %v2855_v58 }
  0xb9   :  { %2319 = vmatprep.subr.bf16.mxu0 %v2905_v37 }
  0xbb   :  { %1908 = vmatmul.mubr.f32.vlgmr.msra.gmra.mrb[0].mxu0 %v180_v63  ;;  %v831_v63 = vld [vmem:[#allocation7 + $0x30] sm:$0xff] }
  0xbc   :  { %2321 = vmatpush3.bf16.msra.mxu0 %v2905_v37  ;;  %1942 = vmatprep.mubr.f32.mxu0 %v2806_v17  ;;  %v867_v3 = vand.u32 4294901760, %v831_v63  ;;  %v3036_v37 = vld [vmem:[#allocation7 + $0x58] sm:$0xff] }
  0xbd   :  { %2323 = vmatprep.subr.bf16.mxu0 %v2907_v38 }
  0xbe   :  { %v3022_v5 = vpack.c.bf16 %v870_v4, %v867_v3 }
  0xc0   :  { %2325 = vmatpush3.bf16.msra.mxu0 %v2907_v38  ;;  %v879_v38 = vand.u32 4294901760, %v3034_v16 }
  0xc1   :  { %2327 = vmatprep.subr.bf16.mxu0 %v2910_v44 }
  0xc4   :  { %2329 = vmatpush3.bf16.msra.mxu0 %v2910_v44  ;;  %v882_v44 = vand.u32 4294901760, %v3036_v37 }
  0xc5   :  { %2331 = vmatprep.subr.bf16.mxu0 %v2912_v45 }
  0xc8   :  { %2333 = vmatpush3.bf16.msra.mxu0 %v2912_v45  ;;  %v3042_v45 = vpack.c.bf16 %v882_v44, %v879_v38 }
  0xc9   :  { %2335 = vmatprep.subr.bf16.mxu0 %v2914_v46 }
  0xcc   :  { %2337 = vmatpush3.bf16.msra.mxu0 %v2914_v46  ;;  %v3044_v46 = vld [vmem:[#allocation7 + $0x60] sm:$0xff] }
  0xcd   :  { %2339 = vmatprep.subr.bf16.mxu0 %v2917_v48 }
  0xd0   :  { %2341 = vmatpush3.bf16.msra.mxu0 %v2917_v48  ;;  %v3046_v48 = vld [vmem:[#allocation7 + $0x68] sm:$0xff] }
  0xd1   :  { %2343 = vmatprep.subr.bf16.mxu0 %v2919_v52 }
  0xd4   :  { %2345 = vmatpush3.bf16.msra.mxu0 %v2919_v52  ;;  %v885_v52 = vand.u32 4294901760, %v3044_v46 }
  0xd5   :  { %2347 = vmatprep.subr.bf16.mxu0 %v2921_v39 }
  0xd8   :  { %2349 = vmatpush3.bf16.msra.mxu0 %v2921_v39  ;;  %v888_v39 = vand.u32 4294901760, %v3046_v48 }
  0xd9   :  { %2351 = vmatprep.subr.bf16.mxu0 %v2796_v10 }
  0xda   :  { %v3056_v11 = vpack.c.bf16 %v888_v39, %v885_v52 }
  0xdb   :  { %1943 = vmatmul.mubr.f32.vlgmr.msra.gmra.mrb[0].mxu0 %v2830_v40 }
  0xdc   :  { %2353 = vmatpush3.bf16.msra.mxu0 %v2796_v10  ;;  %1977 = vmatprep.mubr.f32.mxu0 %v2806_v17  ;;  %v825_v10 = vld [vmem:[#allocation7] sm:$0xff] }
  0xdd   :  { %2355 = vmatprep.subr.bf16.mxu0 %v2798_v13  ;;  %v849_v17 = vand.u32 4294901760, %v825_v10 }
  0xdf   :  { %v3058_v12 = vsub.f32 %v825_v10, %v849_v17  ;;  %v3115_v10 = vsub.f32 %v831_v63, %v867_v3 }
  0xe0   :  { %2357 = vmatpush3.bf16.msra.mxu0 %v2798_v13  ;;  %v826_v13 = vld [vmem:[#allocation7 + $0x8] sm:$0xff] }
  0xe1   :  { %2359 = vmatprep.subr.bf16.mxu0 %v2809_v18  ;;  %v3393_v27 = vand.u32 4294901760, %v3058_v12 }
  0xe3   :  { %v953_v49 = vsub.f32 %v3058_v12, %v3393_v27 }
  0xe4   :  { %2361 = vmatpush3.bf16.msra.mxu0 %v2809_v18  ;;  %v852_v18 = vand.u32 4294901760, %v826_v13 }
  0xe5   :  { %2363 = vmatprep.subr.bf16.mxu0 %v2821_v26  ;;  %v954_v59 = vand.u32 4294901760, %v953_v49 }
  0xe6   :  { %v3010_v23 = vpack.c.bf16 %v852_v18, %v849_v17  ;;  %v3060_v15 = vsub.f32 %v826_v13, %v852_v18  ;;  %v3117_v13 = vsub.f32 %v832_v2, %v870_v4 }
  0xe8   :  { %2365 = vmatpush3.bf16.msra.mxu0 %v2821_v26  ;;  %v828_v26 = vld [vmem:[#allocation7 + $0x18] sm:$0xff]  ;;  %2383 = vmatprep.subr.bf16.mxu1 %v3010_v23  ;;  %v3392_v43 = vand.u32 4294901760, %v3060_v15 }
  0xe9   :  { %2367 = vmatprep.subr.bf16.mxu0 %v2835_v42  ;;  %v858_v51 = vand.u32 4294901760, %v828_v26  ;;  %2385 = vmatpush3.bf16.msra.mxu1 %v3010_v23 }
  0xea   :  { %v960_v54 = vsub.f32 %v3060_v15, %v3392_v43 }
  0xeb   :  { %v3086_v29 = vsub.f32 %v828_v26, %v858_v51  ;;  %v3386_v26 = vand.u32 4294901760, %v3117_v13 }
  0xec   :  { %2369 = vmatpush3.bf16.msra.mxu0 %v2835_v42  ;;  %v855_v42 = vand.u32 4294901760, %v827_v24  ;;  %v961_v30 = vand.u32 4294901760, %v960_v54 }
  0xed   :  { %2371 = vmatprep.subr.bf16.mxu0 %v2851_v56  ;;  %v3390_v61 = vand.u32 4294901760, %v3086_v29 }
  0xee   :  { %v3014_v53 = vpack.c.bf16 %v858_v51, %v855_v42  ;;  %v3084_v28 = vsub.f32 %v827_v24, %v855_v42  ;;  %v3092_v31 = vpack.c.bf16 %v961_v30, %v954_v59  ;;  %v3387_v24 = vand.u32 4294901760, %v3115_v10 }
  0xef   :  { %v974_v32 = vsub.f32 %v3086_v29, %v3390_v61 }
  0xf0   :  { %2373 = vmatpush3.bf16.msra.mxu0 %v2851_v56  ;;  %v830_v56 = vld [vmem:[#allocation7 + $0x28] sm:$0xff]  ;;  %2387 = vmatprep.subr.bf16.mxu1 %v3014_v53  ;;  %v3391_v60 = vand.u32 4294901760, %v3084_v28  ;;  %v995_v51 = vsub.f32 %v3115_v10, %v3387_v24 }
  0xf1   :  { %2375 = vmatprep.subr.bf16.mxu0 %v2853_v57  ;;  %2389 = vmatpush3.bf16.msra.mxu1 %v3014_v53  ;;  %v975_v35 = vand.u32 4294901760, %v974_v32 }
  0xf2   :  { %v967_v62 = vsub.f32 %v3084_v28, %v3391_v60 }
  0xf4   :  { %2377 = vmatpush3.bf16.msra.mxu0 %v2853_v57  ;;  %v864_v57 = vand.u32 4294901760, %v830_v56  ;;  %v968_v34 = vand.u32 4294901760, %v967_v62 }
  0xf5   :  { %2379 = vmatprep.subr.bf16.mxu0 %v2855_v58 }
  0xf6   :  { %v3102_v33 = vsub.f32 %v830_v56, %v864_v57  ;;  %v3107_v36 = vpack.c.bf16 %v975_v35, %v968_v34  ;;  %v3130_v56 = vsub.f32 %v3026_v7, %v876_v9  ;;  %v3144_v7 = vsub.f32 %v3034_v16, %v879_v38 }
  0xf7   :  { %v3169_v38 = vsub.f32 %v3046_v48, %v888_v39  ;;  %v3186_v48 = vsub.f32 %v3064_v19, %v894_v22 }
  0xf8   :  { %2381 = vmatpush3.bf16.msra.mxu0 %v2855_v58  ;;  %v3388_v25 = vand.u32 4294901760, %v3102_v33  ;;  %v3384_v2 = vand.u32 4294901760, %v3130_v56  ;;  %v3383_v59 = vand.u32 4294901760, %v3144_v7 }
  0xf9   :  { %3399 = vst [vmem:[#allocation13_spill] sm:$0xff] %v3169_v38  ;;  %3401 = vst [vmem:[#allocation15_spill] sm:$0xff] %v3186_v48 }
  0xfa   :  { %v988_v50 = vsub.f32 %v3102_v33, %v3388_v25  ;;  %v1023_v32 = vsub.f32 %v3144_v7, %v3383_v59 }
  0xfb   :  { %1978 = vmatmul.mubr.f32.vlgmr.msra.gmra.mrb[0].mxu0 %v2830_v40  ;;  %v861_v40 = vand.u32 4294901760, %v829_v55 }
  0xfc   :  { %v989_v18 = vand.u32 4294901760, %v988_v50 }
  0xfd   :  { %v3018_v58 = vpack.c.bf16 %v864_v57, %v861_v40  ;;  %v3100_v0 = vsub.f32 %v829_v55, %v861_v40  ;;  %v3127_v55 = vsub.f32 %v3024_v6, %v873_v8  ;;  %v1002_v40 = vsub.f32 %v3117_v13, %v3386_v26 }
  0xfe   :  { %v996_v57 = vand.u32 4294901760, %v995_v51  ;;  %v1016_v6 = vsub.f32 %v3130_v56, %v3384_v2  ;;  %v3147_v8 = vsub.f32 %v3036_v37, %v882_v44  ;;  %v3164_v37 = vsub.f32 %v3044_v46, %v885_v52 }
  0xff   :  { %2391 = vmatprep.subr.bf16.mxu1 %v3018_v58  ;;  %v3389_v1 = vand.u32 4294901760, %v3100_v0  ;;  %v3385_v63 = vand.u32 4294901760, %v3127_v55  ;;  %v1003_v3 = vand.u32 4294901760, %v1002_v40  ;;  %v1024_v44 = vand.u32 4294901760, %v1023_v32 }
 0x100   :  { %2393 = vmatpush3.bf16.msra.mxu1 %v3018_v58  ;;  %v1017_v54 = vand.u32 4294901760, %v1016_v6  ;;  %v3382_v30 = vand.u32 4294901760, %v3147_v8  ;;  %3398 = vst [vmem:[#allocation12_spill] sm:$0xff] %v3164_v37  ;;  %v3381_v35 = vand.u32 4294901760, %v3164_v37  ;;  %v3181_v46 = vsub.f32 %v3062_v20, %v891_v21 }
 0x101   :  { %2395 = vmatprep.subr.bf16.mxu1 %v3022_v5  ;;  %v981_v41 = vsub.f32 %v3100_v0, %v3389_v1  ;;  %v1009_v4 = vsub.f32 %v3127_v55, %v3385_v63  ;;  %v3149_v9 = vpack.c.bf16 %v1003_v3, %v996_v57  ;;  %v3378_v51 = vand.u32 4294901760, %v3186_v48 }
 0x102   :  { %v1030_v16 = vsub.f32 %v3147_v8, %v3382_v30  ;;  %3400 = vst [vmem:[#allocation14_spill] sm:$0xff] %v3181_v46  ;;  %v3209_v6 = vpack.c.bf16 %v3086_v29, %v3084_v28  ;;  %v3221_v32 = vpack.c.bf16 %v3130_v56, %v3127_v55 }
 0x103   :  { %v982_v17 = vand.u32 4294901760, %v981_v41  ;;  %v1010_v49 = vand.u32 4294901760, %v1009_v4  ;;  %v3380_v41 = vand.u32 4294901760, %v3169_v38  ;;  %v1058_v21 = vsub.f32 %v3186_v48, %v3378_v51 }
 0x104   :  { %2397 = vmatpush3.bf16.msra.mxu1 %v3022_v5  ;;  %v1031_v34 = vand.u32 4294901760, %v1030_v16  ;;  %v3205_v4 = vpack.c.bf16 %v3060_v15, %v3058_v12  ;;  %v3225_v16 = vpack.c.bf16 %v3147_v8, %v3144_v7 }
 0x105   :  { %2399 = vmatprep.subr.bf16.mxu1 %v3032_v14  ;;  %v3121_v42 = vpack.c.bf16 %v989_v18, %v982_v17  ;;  %v3153_v62 = vpack.c.bf16 %v1017_v54, %v1010_v49  ;;  %v1037_v17 = vsub.f32 %v3164_v37, %v3381_v35  ;;  %v1044_v52 = vsub.f32 %v3169_v38, %v3380_v41 }
 0x106   :  { %v3173_v50 = vpack.c.bf16 %v1031_v34, %v1024_v44  ;;  %v3379_v18 = vand.u32 4294901760, %v3181_v46  ;;  %v1059_v57 = vand.u32 4294901760, %v1058_v21  ;;  %v3213_v49 = vpack.c.bf16 %v3102_v33, %v3100_v0 }
 0x107   :  { %v1038_v39 = vand.u32 4294901760, %v1037_v17  ;;  %v1045_v40 = vand.u32 4294901760, %v1044_v52  ;;  %v3217_v54 = vpack.c.bf16 %v3117_v13, %v3115_v10  ;;  %v3229_v44 = vpack.c.bf16 %v3169_v38, %v3164_v37  ;;  %v1552_v17 = vld [vmem:[%s3374_s2] ss:$0 sm:$0xff] }
 0x108   :  { %2401 = vmatpush3.bf16.msra.mxu1 %v3032_v14  ;;  %v1051_v20 = vsub.f32 %v3181_v46, %v3379_v18  ;;  %v3233_v34 = vpack.c.bf16 %v3186_v48, %v3181_v46 }
 0x109   :  { %2403 = vmatprep.subr.bf16.mxu1 %v3042_v45  ;;  %v3199_v19 = vpack.c.bf16 %v1045_v40, %v1038_v39 }
 0x10a   :  { %v1052_v22 = vand.u32 4294901760, %v1051_v20 }
 0x10c   :  { %2405 = vmatpush3.bf16.msra.mxu1 %v3042_v45  ;;  %v3201_v3 = vpack.c.bf16 %v1059_v57, %v1052_v22 }
 0x10d   :  { %2407 = vmatprep.subr.bf16.mxu1 %v3056_v11 }
 0x110   :  { %2409 = vmatpush3.bf16.msra.mxu1 %v3056_v11 }
 0x111   :  { %2411 = vmatprep.subr.bf16.mxu1 %v3076_v47 }
 0x114   :  { %2413 = vmatpush3.bf16.msra.mxu1 %v3076_v47 }
 0x115   :  { %2415 = vmatprep.subr.bf16.mxu1 %v3092_v31 }
 0x1ce   :  { %v1979_v52 = vpop.f32.mrb[0].mxu0 }
 0x1cf   :  { %v2574_v39 = vadd.f32 %v1979_v52, %v1552_v17  ;;  %v761_v40 = vpop.f32.mrb[1].mxu0 }
 0x1d0   :  { %v2575_v20 = vadd.f32 %v1552_v17, %v761_v40 }
 0x1d1   :  { %v774_v21 = vmul.f32 0.70710677, %v2574_v39 }
 0x1d2   :  { %v773_v22 = vmul.f32 0.70710677, %v2575_v20 }
 0x1d3   :  { %v780_v57 = vand.u32 2147483647, %v774_v21  ;;  %vm776_vm0 = vcmp.ge.f32.partialorder %v774_v21, 0.0 }
 0x1d4   :  { %v779_v51 = vand.u32 2147483647, %v773_v22  ;;  %vm775_vm1 = vcmp.ge.f32.partialorder %v773_v22, 0.0 }
 0x1d5   :  { %v782_v18 = vmul.f32 0.3275911, %v780_v57  ;;  %v808_v59 = vsub.f32 0.0, %v780_v57 }
 0x1d6   :  { %v781_v41 = vmul.f32 0.3275911, %v779_v51  ;;  %v807_v2 = vsub.f32 0.0, %v779_v51 }
 0x1d7   :  { %v784_v35 = vadd.f32 1.0, %v782_v18  ;;  %v810_v26 = vmul.f32 %v808_v59, %v780_v57 }
 0x1d8   :  { %v783_v30 = vadd.f32 1.0, %v781_v41  ;;  %v809_v1 = vmul.f32 %v807_v2, %v779_v51 }
 0x1d9   :  { %2605 = vrcp.f32 %v784_v35  ;;  %v813_v17 = vmul.f32 1.442695, %v810_v26 }
 0x1da   :  { %2607 = vrcp.f32 %v783_v30  ;;  %v811_v43 = vmul.f32 1.442695, %v809_v1 }
 0x1db   :  { %2609 = vpow2.f32 %v813_v17 }
 0x1dc   :  { %2611 = vpow2.f32 %v811_v43 }
 0x1e3   :  { %v2606_v63 = vpop.eup %2605 }
 0x1e4   :  { %v2608_v24 = vpop.eup %2607  ;;  %v790_v25 = vmul.f32 1.0614054, %v2606_v63 }
 0x1e5   :  { %v789_v52 = vmul.f32 1.0614054, %v2608_v24  ;;  %v2610_v51 = vpop.eup %2609 }
 0x1e6   :  { %v792_v61 = vadd.f32 -1.4531521, %v790_v25  ;;  %v2612_v26 = vpop.eup %2611 }
 0x1e7   :  { %v791_v40 = vadd.f32 -1.4531521, %v789_v52  ;;  %v2712_v52 = vmov -1.0  }
 0x1e8   :  { %v794_v60 = vmul.f32 %v2606_v63, %v792_v61  ;;  %v777_v17 = vsel %vm775_vm1, 1.0, %v2712_v52 }
 0x1e9   :  { %v793_v27 = vmul.f32 %v2608_v24, %v791_v40 }
 0x1ea   :  { %v796_v48 = vadd.f32 1.4214138, %v794_v60 }
 0x1eb   :  { %v795_v18 = vadd.f32 1.4214138, %v793_v27  ;;  %v778_v27 = vsel %vm776_vm0, 1.0, %v2712_v52 }
 0x1ec   :  { %v798_v41 = vmul.f32 %v2606_v63, %v796_v48 }
 0x1ed   :  { %v797_v30 = vmul.f32 %v2608_v24, %v795_v18  ;;  %v772_v18 = vmul.f32 0.5, %v2574_v39 }
 0x1ee   :  { %v800_v35 = vadd.f32 -0.28449672, %v798_v41 }
 0x1ef   :  { %v799_v46 = vadd.f32 -0.28449672, %v797_v30 }
 0x1f0   :  { %v802_v38 = vmul.f32 %v2606_v63, %v800_v35 }
 0x1f1   :  { %v801_v59 = vmul.f32 %v2608_v24, %v799_v46  ;;  %v771_v46 = vmul.f32 0.5, %v2575_v20 }
 0x1f2   :  { %v804_v57 = vadd.f32 0.2548296, %v802_v38 }
 0x1f3   :  { %v803_v37 = vadd.f32 0.2548296, %v801_v59 }
 0x1f4   :  { %v806_v2 = vmul.f32 %v2606_v63, %v804_v57 }
 0x1f5   :  { %v805_v25 = vmul.f32 %v2608_v24, %v803_v37 }
 0x1f6   :  { %v816_v61 = vmul.f32 %v2610_v51, %v806_v2 }
 0x1f7   :  { %v815_v1 = vmul.f32 %v2612_v26, %v805_v25 }
 0x1f8   :  { %v818_v60 = vsub.f32 1.0, %v816_v61 }
 0x1f9   :  { %v817_v48 = vsub.f32 1.0, %v815_v1 }
 0x1fa   :  { %v820_v43 = vmul.f32 %v818_v60, %v778_v27 }
 0x1fb   :  { %v819_v40 = vmul.f32 %v817_v48, %v777_v17 }
 0x1fc   :  { %v822_v41 = vadd.f32 1.0, %v820_v43 }
 0x1fd   :  { %v821_v38 = vadd.f32 1.0, %v819_v40 }
 0x1fe   :  { %v824_v30 = vmul.f32 %v822_v41, %v772_v18 }
 0x1ff   :  { %v823_v63 = vmul.f32 %v821_v38, %v771_v46 }
 0x200   :  { %v3238_v35 = vand.u32 4294901760, %v824_v30 }
 0x201   :  { %v3240_v24 = vand.u32 4294901760, %v823_v63 }
 0x202   :  { %v3243_v37 = vsub.f32 %v824_v30, %v3238_v35 }
 0x203   :  { %v930_v21 = vsub.f32 %v823_v63, %v3240_v24 }
 0x204   :  { %v941_v22 = vand.u32 4294901760, %v3243_v37 }
 0x205   :  { %v931_v59 = vand.u32 4294901760, %v930_v21 }
 0x206   :  { %v942_v39 = vsub.f32 %v3243_v37, %v941_v22 }
 0x207   :  { %v932_v20 = vsub.f32 %v930_v21, %v931_v59 }
 0x208   :  { %v943_v2 = vand.u32 4294901760, %v942_v39 }
 0x209   :  { %v933_v57 = vand.u32 4294901760, %v932_v20 }
 0x20b   :  { %2012 = vmatprep.mubr.f32.mxu1 %v933_v57 }
 0x20c   :  { %2013 = vmatmul.mubr.f32.vlgmr.msra.gmra.mrb[0].mxu1 %v943_v2 }
 0x20d   :  { %2417 = vmatpush3.bf16.msra.mxu1 %v3092_v31  ;;  %2047 = vmatprep.mubr.f32.mxu1 %v3240_v24  ;;  %v3402_v31 = vand.u32 4294901760, %v3058_v12  ;;  %v3406_v12 = vand.u32 4294901760, %v3100_v0  ;;  %v3412_v0 = vand.u32 4294901760, %v3144_v7 }
 0x20e   :  { %2419 = vmatprep.subr.bf16.mxu1 %v3107_v36 }
 0x211   :  { %2421 = vmatpush3.bf16.msra.mxu1 %v3107_v36  ;;  %v3403_v36 = vand.u32 4294901760, %v3060_v15  ;;  %v3407_v15 = vand.u32 4294901760, %v3102_v33  ;;  %v3413_v33 = vand.u32 4294901760, %v3147_v8 }
 0x212   :  { %2423 = vmatprep.subr.bf16.mxu1 %v3121_v42 }
 0x215   :  { %2425 = vmatpush3.bf16.msra.mxu1 %v3121_v42  ;;  %v2510_v42 = vpack.c.bf16 %v3403_v36, %v3402_v31 }
 0x216   :  { %2427 = vmatprep.subr.bf16.mxu1 %v3149_v9 }
 0x219   :  { %2429 = vmatpush3.bf16.msra.mxu1 %v3149_v9  ;;  %v3404_v9 = vand.u32 4294901760, %v3084_v28  ;;  %v3409_v28 = vand.u32 4294901760, %v3117_v13  ;;  %v3416_v13 = vld [vmem:[#allocation13_spill] sm:$0xff] }
 0x21a   :  { %2431 = vmatprep.subr.bf16.mxu1 %v3153_v62 }
 0x21d   :  { %2433 = vmatpush3.bf16.msra.mxu1 %v3153_v62  ;;  %v3405_v62 = vand.u32 4294901760, %v3086_v29 }
 0x21e   :  { %2435 = vmatprep.subr.bf16.mxu1 %v3173_v50 }
 0x221   :  { %2437 = vmatpush3.bf16.msra.mxu1 %v3173_v50  ;;  %v2514_v50 = vpack.c.bf16 %v3405_v62, %v3404_v9 }
 0x222   :  { %2439 = vmatprep.subr.bf16.mxu1 %v3199_v19 }
 0x225   :  { %2441 = vmatpush3.bf16.msra.mxu1 %v3199_v19  ;;  %v2518_v19 = vpack.c.bf16 %v3407_v15, %v3406_v12 }
 0x226   :  { %2443 = vmatprep.subr.bf16.mxu1 %v3201_v3 }
 0x229   :  { %2445 = vmatpush3.bf16.msra.mxu1 %v3201_v3  ;;  %v3408_v3 = vand.u32 4294901760, %v3115_v10  ;;  %v3414_v10 = vld [vmem:[#allocation12_spill] sm:$0xff] }
 0x22a   :  { %2447 = vmatprep.subr.bf16.mxu1 %v3205_v4 }
 0x22b   :  { %v2522_v29 = vpack.c.bf16 %v3409_v28, %v3408_v3 }
 0x22c   :  { %2048 = vmatmul.mubr.f32.vlgmr.msra.gmra.mrb[0].mxu1 %v3238_v35 }
 0x22d   :  { %2449 = vmatpush3.bf16.msra.mxu1 %v3205_v4  ;;  %2082 = vmatprep.mubr.f32.mxu1 %v930_v21  ;;  %v3410_v4 = vand.u32 4294901760, %v3127_v55  ;;  %v3418_v55 = vld [vmem:[#allocation14_spill] sm:$0xff] }
 0x22e   :  { %2451 = vmatprep.subr.bf16.mxu1 %v3209_v6 }
 0x231   :  { %2453 = vmatpush3.bf16.msra.mxu1 %v3209_v6  ;;  %v3411_v6 = vand.u32 4294901760, %v3130_v56  ;;  %v3420_v56 = vld [vmem:[#allocation15_spill] sm:$0xff] }
 0x232   :  { %2455 = vmatprep.subr.bf16.mxu1 %v3213_v49  ;;  %v3421_v51 = vand.u32 4294901760, %v3420_v56 }
 0x235   :  { %2457 = vmatpush3.bf16.msra.mxu1 %v3213_v49  ;;  %v2526_v49 = vpack.c.bf16 %v3411_v6, %v3410_v4 }
 0x236   :  { %2459 = vmatprep.subr.bf16.mxu1 %v3217_v54 }
 0x239   :  { %2461 = vmatpush3.bf16.msra.mxu1 %v3217_v54  ;;  %v2530_v54 = vpack.c.bf16 %v3413_v33, %v3412_v0 }
 0x23a   :  { %2463 = vmatprep.subr.bf16.mxu1 %v3221_v32 }
 0x23d   :  { %2465 = vmatpush3.bf16.msra.mxu1 %v3221_v32  ;;  %v3415_v32 = vand.u32 4294901760, %v3414_v10 }
 0x23e   :  { %2467 = vmatprep.subr.bf16.mxu1 %v3225_v16 }
 0x241   :  { %2469 = vmatpush3.bf16.msra.mxu1 %v3225_v16  ;;  %v3417_v16 = vand.u32 4294901760, %v3416_v13 }
 0x242   :  { %2471 = vmatprep.subr.bf16.mxu1 %v3229_v44 }
 0x245   :  { %2473 = vmatpush3.bf16.msra.mxu1 %v3229_v44  ;;  %v2534_v44 = vpack.c.bf16 %v3417_v16, %v3415_v32 }
 0x246   :  { %2475 = vmatprep.subr.bf16.mxu1 %v3233_v34 }
 0x249   :  { %2477 = vmatpush3.bf16.msra.mxu1 %v3233_v34  ;;  %v3419_v34 = vand.u32 4294901760, %v3418_v55 }
 0x24a   :  { %2479 = vmatprep.subr.bf16.mxu1 %v3010_v23 }
 0x24b   :  { %v2538_v25 = vpack.c.bf16 %v3421_v51, %v3419_v34 }
 0x24c   :  { %2083 = vmatmul.mubr.f32.vlgmr.msra.gmra.mrb[0].mxu1 %v3243_v37 }
 0x24d   :  { %2481 = vmatpush3.bf16.msra.mxu1 %v3010_v23  ;;  %2117 = vmatprep.mubr.f32.mxu1 %v931_v59 }
 0x24e   :  { %2483 = vmatprep.subr.bf16.mxu1 %v3014_v53 }
 0x251   :  { %2485 = vmatpush3.bf16.msra.mxu1 %v3014_v53 }
 0x252   :  { %2487 = vmatprep.subr.bf16.mxu1 %v3018_v58 }
 0x255   :  { %2489 = vmatpush3.bf16.msra.mxu1 %v3018_v58 }
 0x256   :  { %2491 = vmatprep.subr.bf16.mxu1 %v3022_v5 }
 0x259   :  { %2493 = vmatpush3.bf16.msra.mxu1 %v3022_v5 }
 0x25a   :  { %2495 = vmatprep.subr.bf16.mxu1 %v3032_v14 }
 0x25d   :  { %2497 = vmatpush3.bf16.msra.mxu1 %v3032_v14 }
 0x25e   :  { %2499 = vmatprep.subr.bf16.mxu1 %v3042_v45 }
 0x261   :  { %2501 = vmatpush3.bf16.msra.mxu1 %v3042_v45 }
 0x262   :  { %2503 = vmatprep.subr.bf16.mxu1 %v3056_v11 }
 0x265   :  { %2505 = vmatpush3.bf16.msra.mxu1 %v3056_v11 }
 0x266   :  { %2507 = vmatprep.subr.bf16.mxu1 %v3076_v47 }
 0x269   :  { %2509 = vmatpush3.bf16.msra.mxu1 %v3076_v47 }
 0x26a   :  { %2511 = vmatprep.subr.bf16.mxu1 %v2510_v42 }
 0x26c   :  { %2118 = vmatmul.mubr.f32.vlgmr.msra.gmra.mrb[0].mxu1 %v941_v22 }
 0x26d   :  { %2513 = vmatpush3.bf16.msra.mxu1 %v2510_v42  ;;  %2152 = vmatprep.mubr.f32.mxu1 %v3240_v24 }
 0x26e   :  { %2515 = vmatprep.subr.bf16.mxu1 %v2514_v50 }
 0x271   :  { %2517 = vmatpush3.bf16.msra.mxu1 %v2514_v50 }
 0x272   :  { %2519 = vmatprep.subr.bf16.mxu1 %v2518_v19 }
 0x275   :  { %2521 = vmatpush3.bf16.msra.mxu1 %v2518_v19 }
 0x276   :  { %2523 = vmatprep.subr.bf16.mxu1 %v2522_v29 }
 0x279   :  { %2525 = vmatpush3.bf16.msra.mxu1 %v2522_v29 }
 0x27a   :  { %2527 = vmatprep.subr.bf16.mxu1 %v2526_v49 }
 0x27d   :  { %2529 = vmatpush3.bf16.msra.mxu1 %v2526_v49 }
 0x27e   :  { %2531 = vmatprep.subr.bf16.mxu1 %v2530_v54 }
 0x281   :  { %2533 = vmatpush3.bf16.msra.mxu1 %v2530_v54 }
 0x282   :  { %2535 = vmatprep.subr.bf16.mxu1 %v2534_v44 }
 0x285   :  { %2537 = vmatpush3.bf16.msra.mxu1 %v2534_v44 }
 0x286   :  { %2539 = vmatprep.subr.bf16.mxu1 %v2538_v25 }
 0x289   :  { %2541 = vmatpush3.bf16.msra.mxu1 %v2538_v25 }
 0x28a   :  { %2543 = vmatprep.subr.bf16.mxu1 %v3010_v23 }
 0x28c   :  { %2153 = vmatmul.mubr.f32.vlgmr.msra.gmra.mrb[0].mxu1 %v3238_v35 }
 0x28d   :  { %2545 = vmatpush3.bf16.msra.mxu1 %v3010_v23  ;;  %2187 = vmatprep.mubr.f32.mxu1 %v3240_v24  ;;  %v1553_v23 = vld [vmem:[%s3376_s4] ss:$0 sm:$0xff] }
 0x28e   :  { %2547 = vmatprep.subr.bf16.mxu1 %v3014_v53 }
 0x291   :  { %2549 = vmatpush3.bf16.msra.mxu1 %v3014_v53 }
 0x292   :  { %2551 = vmatprep.subr.bf16.mxu1 %v3018_v58 }
 0x295   :  { %2553 = vmatpush3.bf16.msra.mxu1 %v3018_v58 }
 0x296   :  { %2555 = vmatprep.subr.bf16.mxu1 %v3022_v5 }
 0x299   :  { %2557 = vmatpush3.bf16.msra.mxu1 %v3022_v5 }
 0x29a   :  { %2559 = vmatprep.subr.bf16.mxu1 %v3032_v14 }
 0x29d   :  { %2561 = vmatpush3.bf16.msra.mxu1 %v3032_v14 }
 0x29e   :  { %2563 = vmatprep.subr.bf16.mxu1 %v3042_v45 }
 0x2a1   :  { %2565 = vmatpush3.bf16.msra.mxu1 %v3042_v45 }
 0x2a2   :  { %2567 = vmatprep.subr.bf16.mxu1 %v3056_v11 }
 0x2a5   :  { %2569 = vmatpush3.bf16.msra.mxu1 %v3056_v11 }
 0x2a6   :  { %2571 = vmatprep.subr.bf16.mxu1 %v3076_v47 }
 0x2a9   :  { %2573 = vmatpush3.bf16.msra.mxu1 %v3076_v47 }
 0x2ac   :  { %2188 = vmatmul.mubr.f32.vlgmr.msra.gmra.mrb[0].mxu1 %v3238_v35 }
 0x37f   :  { %v2189_v53 = vpop.f32.mrb[0].mxu1 }
 0x380   :  { %v2576_v58 = vadd.f32 %v2189_v53, %v1553_v23  ;;  %v1522_v5 = vpop.f32.mrb[1].mxu1 }
 0x381   :  { %v2577_v14 = vadd.f32 %v1553_v23, %v1522_v5 }
 0x382   :  { %1533 = vst [vmem:[#allocation8 + $0x8] sm:$0xff] %v2576_v58 }
 0x383   :  { %1532 = vst [vmem:[#allocation8] sm:$0xff] %v2577_v14 }
 0x384   :  { %2690 = shalt.err (!%p2687_p0)
}
 0x385   :  { %s2691_s4 = scalar_lea.hbm %s3377_s5, 256 }
 0x386   :  { %p2692_p1 = scmp.ne.s32.totalorder %s3377_s5, %s2691_s4  ;;  %p2695_p2 = scmp.lt.u32.totalorder %s2691_s4, %s3377_s5 }
 0x388   :  { %p2697_p3 = pnand %p2695_p2, %p2692_p1 }
 0x38a   :  { %2700 = shalt.err (!%p2697_p3)
}
 0x38b   :  { %1545 = dma.vmem_to_hbm [thread:$0]  %s1540_s9, 256, %s3377_s5, [#allocation4], %s2709_s30, %s2709_s30, %s2710_s6  }
 0x38c   :  { %2705 = dma.done.wait [#allocation4], 256  }
 0x38d   :  { %2706 = vsyncadd [#allocation4], 4294967040 }
 0x38e   :  { %1549 = vsyncpa [#allocation3], 1 }
 0x38f   :  { %1550 = vsyncpa [#allocation6], 1 }
 0x390   :  { %1551 = vsyncpa [#allocation4], 1 }

</bundles_post_ra>
